<compile_context>
chip_gen: v5e
topology: v5e:2x2
jax: 0.10.0
libtpu: 0.0.40
codegen_flags: <defaults>
</compile_context>

<pallas_src>
import math

import jax
import jax.numpy as jnp
from jax.experimental import pallas as pl
from jax.experimental.pallas import tpu as pltpu  # noqa: F401  (kept for TPU backend)


# ---------------------------------------------------------------------------
# Config (small, deterministic, consistent with the PyTorch module)
# ---------------------------------------------------------------------------
BATCH = 2
SEQ = 8
HIDDEN = 32          # config.hidden_size
VOCAB = 512          # bert_model_embedding_weights.size(0)
LN_EPS = 1e-12


# ---------------------------------------------------------------------------
# Pallas kernel: full BertLMPredictionHead, single invocation (no grid)
# ---------------------------------------------------------------------------
def lm_head_kernel(x_ref, w1_ref, p1_ref, wdec_ref, bdec_ref, out_ref):
    # x_ref    : (N, H)   f32   flattened hidden states (N = B*S)
    # w1_ref   : (H, H)   f32   transform dense weight (stored [in, out])
    # p1_ref   : (3, H)   f32   packed [dense bias; LN gamma; LN beta]
    # wdec_ref : (H, V)   bf16  decoder weight (embedding^T), pre-transposed
    # bdec_ref : (1, V)   f32   decoder bias
    # out_ref  : (N, V)   f32   logits
    x = x_ref[...]

    b1 = p1_ref[0:1, :]
    gamma = p1_ref[1:2, :]
    beta = p1_ref[2:3, :]

    # ---- BertPredictionHeadTransform: dense -> GELU(exact erf) -> LayerNorm
    h = jnp.dot(x, w1_ref[...], preferred_element_type=jnp.float32) + b1
    h = 0.5 * h * (1.0 + jax.lax.erf(h * (1.0 / math.sqrt(2.0))))
    mu = jnp.mean(h, axis=-1, keepdims=True)
    var = jnp.mean(jnp.square(h - mu), axis=-1, keepdims=True)
    h = (h - mu) * jax.lax.rsqrt(var + LN_EPS) * gamma + beta

    # ---- decoder (tied embedding weights, bf16 MXU path, f32 accumulate)
    out_ref[...] = (
        jnp.dot(h.astype(jnp.bfloat16), wdec_ref[...],
                preferred_element_type=jnp.float32)
        + bdec_ref[...]
    )


# ---------------------------------------------------------------------------
# Wrapper: single fused pallas_call, whole arrays as single VMEM blocks
# ---------------------------------------------------------------------------
def bert_lm_prediction_head(hidden_states, params):
    """hidden_states: [B, S, H] f32; returns logits [B, S, V] f32."""
    B, S, H = hidden_states.shape
    V = params['w_dec'].shape[1]
    N = B * S
    x2d = hidden_states.reshape(N, H)

    # No grid: each operand is one whole-array block resident in VMEM for the
    # single kernel invocation (total footprint ~100 KiB).
    out2d = pl.pallas_call(
        lm_head_kernel,
        out_shape=jax.ShapeDtypeStruct((N, V), jnp.float32),
    )(x2d, params['w1'], params['p1'], params['w_dec'], params['b_dec'])

    return out2d.reshape(B, S, V)


# ---------------------------------------------------------------------------
# Deterministic parameter init (synthetic; mirrors the module's shapes)
# ---------------------------------------------------------------------------
def init_params(key, hidden, vocab):
    ks = jax.random.split(key, 4)
    scale = 0.02
    # PyTorch module shapes:
    #   transform.dense_act.Linear.weight : [H, H]  (we store [in, out])
    #   transform.dense_act.Linear.bias   : [H]
    #   transform.LayerNorm.{weight,bias} : [H]
    #   embedding weights                 : [V, H]  (decoder computes x @ E^T)
    #   decoder bias                      : [V]     (zero-init in PyTorch)
    w1 = scale * jax.random.normal(ks[0], (hidden, hidden), jnp.float32)
    b1 = scale * jax.random.normal(ks[1], (hidden,), jnp.float32)
    gamma = jnp.ones((hidden,), jnp.float32)
    beta = jnp.zeros((hidden,), jnp.float32)
    emb = scale * jax.random.normal(ks[2], (vocab, hidden), jnp.float32)
    # bias is zero-initialized in the module; use random values here so the
    # bias-add path is actually exercised by the check.
    b_dec = scale * jax.random.normal(ks[3], (vocab,), jnp.float32)

    return dict(
        w1=w1,
        p1=jnp.stack([b1, gamma, beta], axis=0),       # (3, H) packed row params
        w_dec=emb.T.astype(jnp.bfloat16),              # (H, V) pre-transposed, bf16
        b_dec=b_dec.reshape(1, vocab),                 # (1, V) f32
        # raw f32 copies for the pure-JAX reference
        _b1=b1, _gamma=gamma, _beta=beta, _emb=emb, _bias=b_dec,
    )


# ---------------------------------------------------------------------------
# Pure-JAX f32 reference (module semantics) for a sanity check
# ---------------------------------------------------------------------------
def bert_lm_prediction_head_ref(hidden_states, p):
    h = hidden_states @ p['w1'] + p['_b1']
    h = jax.nn.gelu(h, approximate=False)
    mu = jnp.mean(h, axis=-1, keepdims=True)
    var = jnp.mean((h - mu) ** 2, axis=-1, keepdims=True)
    h = (h - mu) / jnp.sqrt(var + LN_EPS) * p['_gamma'] + p['_beta']
    return h @ p['_emb'].T + p['_bias']


if __name__ == "__main__":
    key = jax.random.PRNGKey(0)
    k_x, k_p = jax.random.split(key)

    hidden_states = jax.random.normal(k_x, (BATCH, SEQ, HIDDEN), jnp.float32)
    params = init_params(k_p, HIDDEN, VOCAB)

    out = bert_lm_prediction_head(hidden_states, params)
    out = jax.block_until_ready(out)

    ref = bert_lm_prediction_head_ref(hidden_states, params)
    assert out.shape == (BATCH, SEQ, VOCAB)
    # Tolerance accounts for bf16 storage of the decoder weights / activations
    # (everything else is f32); per the perf review this is the gated numerics
    # tradeoff for halving the dominant HBM transfer.
    err = jnp.max(jnp.abs(out - ref))
    assert jnp.allclose(out, ref, atol=2e-2, rtol=2e-2), f"max abs err {err}"

    print("KERNEL_OK")
</pallas_src>

<mosaic_0001>
module attributes {stable_mosaic.version = 11 : i64} {
  func.func @lm_head_kernel(%arg0: memref<16x32xf32, #tpu.memory_space<vmem>>, %arg1: memref<32x32xf32, #tpu.memory_space<vmem>>, %arg2: memref<3x32xf32, #tpu.memory_space<vmem>>, %arg3: memref<32x512xbf16, #tpu.memory_space<vmem>>, %arg4: memref<1x512xf32, #tpu.memory_space<vmem>>, %arg5: memref<16x512xf32, #tpu.memory_space<vmem>>) attributes {dimension_semantics = [], scalar_prefetch = 0 : i64, scratch_operands = 0 : i64, tpu.core_type = #tpu.core_type<tc>} {
    %c0 = arith.constant 0 : index
    %c0_0 = arith.constant 0 : index
    %0 = vector.load %arg0[%c0, %c0_0] : memref<16x32xf32, #tpu.memory_space<vmem>>, vector<16x32xf32>
    %c0_1 = arith.constant 0 : index
    %c0_2 = arith.constant 0 : index
    %1 = vector.load %arg2[%c0_1, %c0_2] : memref<3x32xf32, #tpu.memory_space<vmem>>, vector<1x32xf32>
    %c1 = arith.constant 1 : index
    %c0_3 = arith.constant 0 : index
    %2 = vector.load %arg2[%c1, %c0_3] : memref<3x32xf32, #tpu.memory_space<vmem>>, vector<1x32xf32>
    %c2 = arith.constant 2 : index
    %c0_4 = arith.constant 0 : index
    %3 = vector.load %arg2[%c2, %c0_4] : memref<3x32xf32, #tpu.memory_space<vmem>>, vector<1x32xf32>
    %c0_5 = arith.constant 0 : index
    %c0_6 = arith.constant 0 : index
    %4 = vector.load %arg1[%c0_5, %c0_6] : memref<32x32xf32, #tpu.memory_space<vmem>>, vector<32x32xf32>
    %cst = arith.constant dense<0.000000e+00> : vector<16x32xf32>
    %5 = tpu.matmul %0, %4, %cst {dimension_numbers = #tpu.dot_dimension_numbers<[1], [0], [0], [1], [0, 0, 1, 1], [], []>} : vector<16x32xf32>, vector<32x32xf32>, vector<16x32xf32> -> vector<16x32xf32>
    %6 = vector.broadcast %1 : vector<1x32xf32> to vector<16x32xf32>
    %7 = arith.addf %5, %6 : vector<16x32xf32>
    %cst_7 = arith.constant 5.000000e-01 : f32
    %8 = vector.broadcast %cst_7 : f32 to vector<16x32xf32>
    %9 = arith.mulf %8, %7 : vector<16x32xf32>
    %cst_8 = arith.constant 0.707106769 : f32
    %10 = vector.broadcast %cst_8 : f32 to vector<16x32xf32>
    %11 = arith.mulf %7, %10 : vector<16x32xf32>
    %12 = math.erf %11 : vector<16x32xf32>
    %cst_9 = arith.constant 1.000000e+00 : f32
    %13 = vector.broadcast %cst_9 : f32 to vector<16x32xf32>
    %14 = arith.addf %13, %12 : vector<16x32xf32>
    %15 = arith.mulf %9, %14 : vector<16x32xf32>
    %cst_10 = arith.constant dense<0.000000e+00> : vector<16xf32>
    %16 = vector.multi_reduction <add>, %15, %cst_10 [1] : vector<16x32xf32> to vector<16xf32>
    %17 = vector.shape_cast %16 : vector<16xf32> to vector<16x1xf32>
    %cst_11 = arith.constant 3.200000e+01 : f32
    %18 = vector.broadcast %cst_11 : f32 to vector<16x1xf32>
    %19 = arith.divf %17, %18 : vector<16x1xf32>
    %20 = vector.broadcast %19 : vector<16x1xf32> to vector<16x32xf32>
    %21 = arith.subf %15, %20 : vector<16x32xf32>
    %22 = arith.mulf %21, %21 : vector<16x32xf32>
    %cst_12 = arith.constant dense<0.000000e+00> : vector<16xf32>
    %23 = vector.multi_reduction <add>, %22, %cst_12 [1] : vector<16x32xf32> to vector<16xf32>
    %24 = vector.shape_cast %23 : vector<16xf32> to vector<16x1xf32>
    %cst_13 = arith.constant 3.200000e+01 : f32
    %25 = vector.broadcast %cst_13 : f32 to vector<16x1xf32>
    %26 = arith.divf %24, %25 : vector<16x1xf32>
    %27 = vector.broadcast %19 : vector<16x1xf32> to vector<16x32xf32>
    %28 = arith.subf %15, %27 : vector<16x32xf32>
    %cst_14 = arith.constant 9.99999996E-13 : f32
    %29 = vector.broadcast %cst_14 : f32 to vector<16x1xf32>
    %30 = arith.addf %26, %29 : vector<16x1xf32>
    %31 = math.rsqrt %30 : vector<16x1xf32>
    %32 = vector.broadcast %31 : vector<16x1xf32> to vector<16x32xf32>
    %33 = arith.mulf %28, %32 : vector<16x32xf32>
    %34 = vector.broadcast %2 : vector<1x32xf32> to vector<16x32xf32>
    %35 = arith.mulf %33, %34 : vector<16x32xf32>
    %36 = vector.broadcast %3 : vector<1x32xf32> to vector<16x32xf32>
    %37 = arith.addf %35, %36 : vector<16x32xf32>
    %38 = arith.truncf %37 : vector<16x32xf32> to vector<16x32xbf16>
    %c0_15 = arith.constant 0 : index
    %c0_16 = arith.constant 0 : index
    %39 = vector.load %arg3[%c0_15, %c0_16] : memref<32x512xbf16, #tpu.memory_space<vmem>>, vector<32x512xbf16>
    %cst_17 = arith.constant dense<0.000000e+00> : vector<16x512xf32>
    %40 = tpu.matmul %38, %39, %cst_17 {dimension_numbers = #tpu.dot_dimension_numbers<[1], [0], [0], [1], [0, 0, 1, 1], [], []>} : vector<16x32xbf16>, vector<32x512xbf16>, vector<16x512xf32> -> vector<16x512xf32>
    %c0_18 = arith.constant 0 : index
    %c0_19 = arith.constant 0 : index
    %41 = vector.load %arg4[%c0_18, %c0_19] : memref<1x512xf32, #tpu.memory_space<vmem>>, vector<1x512xf32>
    %42 = vector.broadcast %41 : vector<1x512xf32> to vector<16x512xf32>
    %43 = arith.addf %40, %42 : vector<16x512xf32>
    %c0_20 = arith.constant 0 : index
    %c0_21 = arith.constant 0 : index
    %44 = vector.load %arg5[%c0_20, %c0_21] : memref<16x512xf32, #tpu.memory_space<vmem>>, vector<16x512xf32>
    tpu.vector_store %arg5[%c0_20, %c0_21], %43 {strides = array<i32>} : memref<16x512xf32, #tpu.memory_space<vmem>>, vector<16x512xf32>,
    return
  }
}

</mosaic_0001>

<bundles_post_ra>
// kernel: tpu_custom_call.1
= control target key start
LH: loop header
LB: loop body
LE: loop exit
PB: predicated region body
PF: predicated region fallthrough
CT: control target
= control target key end

     0   :  { %10 = vsyncpa [#allocation3], 0  ;;  %s757_s0 = inlined_call_operand.hbm [shape: f32[16,32], index: 0, kind: input, shape index: {}]   ;;  %s758_s1 = inlined_call_operand.hbm [shape: f32[32,32], index: 1, kind: input, shape index: {}]   ;;  %s759_s2 = inlined_call_operand.hbm [shape: f32[3,32], index: 2, kind: input, shape index: {}]   ;;  %s760_s3 = inlined_call_operand.hbm [shape: bf16[32,512], index: 3, kind: input, shape index: {}]   ;;  %s761_s4 = inlined_call_operand.hbm [shape: f32[1,512], index: 4, kind: input, shape index: {}]   ;;  %s762_s5 = inlined_call_operand.hbm [shape: f32[16,512], index: 5, kind: output, shape index: {}]  }
   0x1   :  { %11 = vsyncpa [#allocation6], 0 }
   0x2   :  { %12 = vsyncpa [#allocation9], 0 }
   0x3   :  { %13 = vsyncpa [#allocation4], 0  ;;  %s31_s20 = sshll.u32 %s758_s1, 4  ;;  %s658_s21 = smov [#allocation5]   ;;  %s32_s20 = int_to_ptr.hbm [resolvable:$true] %s31_s20 }
   0x4   :  { %s33_s22 = sshll.u32 %s658_s21, 4  ;;  %s55_s25 = sshll.u32 %s760_s3, 4  ;;  %s34_s22 = int_to_ptr.vmem [resolvable:$true] %s33_s22  ;;  %s56_s25 = int_to_ptr.hbm [resolvable:$true] %s55_s25 }
   0x5   :  { %s659_s26 = smov 128   ;;  %s660_s27 = smov 8  }
   0x6   :  { %39 = dma.hbm_to_vmem [thread:$0]  %s32_s20, 512, %s34_s22, [#allocation6], %s659_s26, %s659_s26, %s660_s27  }
   0x7   :  { %s661_s28 = smov [#allocation8]   ;;  %s662_s30 = smov 256  }
   0x8   :  { %s57_s29 = sshll.u32 %s661_s28, 4  ;;  %s663_s6 = smov 16   ;;  %s58_s29 = int_to_ptr.vmem [resolvable:$true] %s57_s29 }
   0x9   :  { %63 = dma.hbm_to_vmem [thread:$0]  %s56_s25, 1024, %s58_s29, [#allocation9], %s662_s30, %s662_s30, %s663_s6  }
   0xa   :  { %s18_s8 = sshll.u32 %s757_s0, 4  ;;  %s664_s9 = smov [#allocation2]   ;;  %s19_s8 = int_to_ptr.hbm [resolvable:$true] %s18_s8 }
   0xb   :  { %s20_s10 = sshll.u32 %s664_s9, 4  ;;  %s45_s12 = sshll.u32 %s759_s2, 4  ;;  %s21_s10 = int_to_ptr.vmem [resolvable:$true] %s20_s10  ;;  %s46_s12 = int_to_ptr.hbm [resolvable:$true] %s45_s12 }
   0xc   :  { %26 = dma.hbm_to_vmem [thread:$0]  %s19_s8, 256, %s21_s10, [#allocation3], %s659_s26, %s659_s26, %s660_s27  }
   0xd   :  { %s665_s13 = smov [#allocation7]   ;;  %s69_s17 = sshll.u32 %s761_s4, 4  ;;  %s70_s17 = int_to_ptr.hbm [resolvable:$true] %s69_s17 }
   0xe   :  { %s47_s14 = sshll.u32 %s665_s13, 4  ;;  %s666_s0 = smov [#allocation10]   ;;  %s48_s14 = int_to_ptr.vmem [resolvable:$true] %s47_s14 }
   0xf   :  { %50 = dma.hbm_to_vmem [thread:$0]  %s46_s12, 64, %s48_s14, [#allocation6]  }
  0x10   :  { %s71_s18 = sshll.u32 %s666_s0, 4  ;;  %s72_s18 = int_to_ptr.vmem [resolvable:$true] %s71_s18 }
  0x11   :  { %74 = dma.hbm_to_vmem [thread:$0]  %s70_s17, 64, %s72_s18, [#allocation9]  }
  0x12   :  { %650 = dma.done.wait [#allocation3], 256  }
  0x13   :  { %651 = vsyncadd [#allocation3], 4294967040 }
  0x14   :  { %652 = dma.done.wait [#allocation6], 576  }
  0x15   :  { %653 = vsyncadd [#allocation6], 4294966720 }
  0x16   :  { %654 = dma.done.wait [#allocation9], 1088  }
  0x17   :  { %655 = vsyncadd [#allocation9], 4294966208  ;;  %v104_v0 = vld [vmem:[#allocation5 + $0x18] sm:$0xff]  ;;  %v103_v1 = vld [vmem:[#allocation5 + $0x10] sm:$0xff]  ;;  %vm106_vm0 = vcmask 261120   ;;  %s668_s2 = smov [#allocation11]  }
  0x18   :  { %125 = vmatpush.msra.mxu0 %v104_v0  ;;  %476 = vmatpush.msra.mxu1 %v104_v0  ;;  %v102_v2 = vld [vmem:[#allocation5 + $0x8] sm:$0xff]  ;;  %v101_v3 = vld [vmem:[#allocation5] sm:$0xff]  ;;  %v96_v4 = vld [vmem:[#allocation2] sm:$0xff]  ;;  %s411_s4 = sshll.u32 %s668_s2, 4  ;;  %s413_s21 = sshll.u32 %s762_s5, 4  ;;  %s412_s4 = int_to_ptr.vmem [resolvable:$true] %s411_s4  ;;  %s414_s21 = int_to_ptr.hbm [resolvable:$true] %s413_s21 }
  0x19   :  { %v97_v5 = vld [vmem:[#allocation2 + $0x8] sm:$0xff]  ;;  %v493_v6 = vld [vmem:[#allocation7] ss:$0 sm:$0xff]  ;;  %s669_s22 = smov 512   ;;  %s670_s23 = smov 32  }
  0x1a   :  { %126 = vmatpush.msra.mxu0 %v103_v1  ;;  %477 = vmatpush.msra.mxu1 %v103_v1 }
  0x1c   :  { %127 = vmatpush.msra.mxu0 %v102_v2  ;;  %478 = vmatpush.msra.mxu1 %v102_v2 }
  0x1e   :  { %128 = vmatpush.msra.mxu0 %v101_v3  ;;  %479 = vmatpush.msra.mxu1 %v101_v3 }
  0x1f   :  { %428 = vmatmul.msk.f32.vlgmr.msra.gmra.mxu0 %vm106_vm0, %v96_v4  ;;  %429 = vmatmul.msk.f32.vlgmr.msra.gmra.mxu1 %vm106_vm0, %v97_v5 }
  0x9c   :  { %v130_v7 = vpop.f32.mrf.mxu0  ;;  %v133_v8 = vpop.f32.mrf.mxu1 }
  0x9d   :  { %v718_v9 = vadd.f32 %v493_v6, %v130_v7  ;;  %v720_v10 = vadd.f32 %v493_v6, %v133_v8 }
  0x9f   :  { %v723_v11 = vmul.f32 0.70710677, %v718_v9  ;;  %v726_v12 = vmul.f32 0.70710677, %v720_v10 }
  0xa1   :  { %v140_v13 = vmul.f32 %v723_v11, %v723_v11  ;;  %v180_v14 = vmul.f32 %v726_v12, %v726_v12 }
  0xa3   :  { %v141_v15 = vmin.f32 %v140_v13, 16.0  ;;  %v181_v16 = vmin.f32 %v180_v14, 16.0 }
  0xa5   :  { %v142_v17 = vmul.f32 2.1237322e-06, %v141_v15  ;;  %v182_v18 = vmul.f32 2.1237322e-06, %v181_v16  ;;  %v153_v19 = vmul.f32 3.8918573e-05, %v141_v15 }
  0xa6   :  { %v193_v20 = vmul.f32 3.8918573e-05, %v181_v16 }
  0xa7   :  { %v143_v21 = vadd.f32 0.00028619796, %v142_v17  ;;  %v183_v22 = vadd.f32 0.00028619796, %v182_v18  ;;  %v154_v23 = vadd.f32 0.001143296, %v153_v19 }
  0xa8   :  { %v194_v24 = vadd.f32 0.001143296, %v193_v20 }
  0xa9   :  { %v144_v25 = vmul.f32 %v143_v21, %v141_v15  ;;  %v184_v26 = vmul.f32 %v183_v22, %v181_v16  ;;  %v155_v27 = vmul.f32 %v154_v23, %v141_v15  ;;  %v136_v22 = vmul.f32 0.5, %v718_v9 }
  0xaa   :  { %v195_v28 = vmul.f32 %v194_v24, %v181_v16 }
  0xab   :  { %v145_v29 = vadd.f32 0.0036580483, %v144_v25  ;;  %v156_v30 = vadd.f32 0.014752088, %v155_v27  ;;  %v185_v32 = vadd.f32 0.0036580483, %v184_v26 }
  0xac   :  { %v196_v31 = vadd.f32 0.014752088, %v195_v28  ;;  %v137_v27 = vmul.f32 0.5, %v720_v10 }
  0xad   :  { %v157_v33 = vmul.f32 %v156_v30, %v141_v15  ;;  %v146_v35 = vmul.f32 %v145_v29, %v141_v15  ;;  %v186_v38 = vmul.f32 %v185_v32, %v181_v16  ;;  %v667_v29 = vmov 32.0  }
  0xae   :  { %v197_v34 = vmul.f32 %v196_v31, %v181_v16 }
  0xaf   :  { %v158_v36 = vadd.f32 0.112945676, %v157_v33  ;;  %v147_v41 = vadd.f32 0.05243302, %v146_v35  ;;  %v187_v44 = vadd.f32 0.05243302, %v186_v38 }
  0xb0   :  { %v198_v37 = vadd.f32 0.112945676, %v197_v34 }
  0xb1   :  { %v159_v39 = vmul.f32 %v158_v36, %v141_v15  ;;  %v148_v47 = vmul.f32 %v147_v41, %v141_v15  ;;  %v188_v50 = vmul.f32 %v187_v44, %v181_v16  ;;  %v450_v44 = vld [vmem:[#allocation8 + $0x20] sm:$0xf] }
  0xb2   :  { %v199_v40 = vmul.f32 %v198_v37, %v181_v16 }
  0xb3   :  { %v160_v42 = vadd.f32 0.4994258, %v159_v39  ;;  %v149_v51 = vadd.f32 0.18741608, %v148_v47  ;;  %v189_v52 = vadd.f32 0.18741608, %v188_v50 }
  0xb4   :  { %v200_v43 = vadd.f32 0.4994258, %v199_v40  ;;  %v458_v50 = vld [vmem:[#allocation8 + $0x28] sm:$0xf] }
  0xb5   :  { %v161_v45 = vmul.f32 %v160_v42, %v141_v15  ;;  %v150_v54 = vmul.f32 %v149_v51, %v141_v15  ;;  %v190_v57 = vmul.f32 %v189_v52, %v181_v16  ;;  %v475_v51 = vld [vmem:[#allocation8 + $0x34] sm:$0xf0] }
  0xb6   :  { %v201_v46 = vmul.f32 %v200_v43, %v181_v16 }
  0xb7   :  { %v162_v48 = vadd.f32 1.0, %v161_v45  ;;  %v151_v60 = vadd.f32 1.1283791, %v150_v54  ;;  %v191_v2 = vadd.f32 1.1283791, %v190_v57  ;;  %v459_v54 = vor.u32 %v475_v51, %v458_v50 }
  0xb8   :  { %v202_v49 = vadd.f32 1.0, %v201_v46  ;;  %v474_v45 = vld [vmem:[#allocation8 + $0x2c] sm:$0xf0]  ;;  %v472_v46 = vld [vmem:[#allocation8 + $0x24] sm:$0xf] }
  0xb9   :  { %496 = vrcp.f32 %v162_v48  ;;  %v174_v61 = vand.u32 2147483648, %v162_v48  ;;  %v172_v0 = vand.u32 2147483647, %v162_v48  ;;  %vm168_vm3 = vweird.f32 %v162_v48  ;;  %v434_v57 = vld [vmem:[#allocation8] sm:$0xf]  ;;  %377 = vmatpush.bf16.msra.mxu3 %v459_v54 }
  0xba   :  { %498 = vrcp.f32 %v202_v49  ;;  %v214_v1 = vand.u32 2147483648, %v202_v49  ;;  %v212_v4 = vand.u32 2147483647, %v202_v49  ;;  %vm208_vm5 = vweird.f32 %v202_v49 }
  0xbb   :  { %v175_v6 = vor.u32 1.1754944e-38, %v174_v61  ;;  %v152_v8 = vmul.f32 %v151_v60, %v723_v11  ;;  %vm173_vm6 = vcmp.eq.f32.partialorder %v172_v0, 8.507059e+37  ;;  %v192_v15 = vmul.f32 %v191_v2, %v726_v12  ;;  %v468_v60 = vld [vmem:[#allocation8 + $0x4] sm:$0xf]  ;;  %v436_v61 = vld [vmem:[#allocation8 + $0x10] sm:$0xf0] }
  0xbc   :  { %v215_v14 = vor.u32 1.1754944e-38, %v214_v1  ;;  %vm213_vm8 = vcmp.eq.f32.partialorder %v212_v4, 8.507059e+37  ;;  %500 = vrcp.f32 %v667_v29  ;;  %v439_v0 = vor.u32 %v468_v60, %v436_v61  ;;  %v442_v1 = vld [vmem:[#allocation8 + $0x8] sm:$0xf]  ;;  %v471_v2 = vld [vmem:[#allocation8 + $0x14] sm:$0xf0] }
  0xbd   :  { %v469_v4 = vld [vmem:[#allocation8 + $0xc] sm:$0xf] }
  0xbf   :  { %v497_v53 = vpop.eup %496 }
  0xc0   :  { %v499_v55 = vpop.eup %498  ;;  %v164_v56 = vmul.f32 %v497_v53, %v162_v48  ;;  %vm169_vm1 = vweird.f32 %v497_v53  ;;  %v451_v48 = vor.u32 %v474_v45, %v450_v44 }
  0xc1   :  { %v204_v58 = vmul.f32 %v499_v55, %v202_v49  ;;  %vm209_vm2 = vweird.f32 %v499_v55  ;;  %vm170_vm4 = vmor %vm168_vm3, %vm169_vm1  ;;  %v452_v49 = vld [vmem:[#allocation8 + $0x30] sm:$0xf0] }
  0xc2   :  { %v165_v59 = vsub.f32 1.0, %v164_v56  ;;  %vm210_vm7 = vmor %vm208_vm5, %vm209_vm2  ;;  %v501_v30 = vpop.eup %500  ;;  %v460_v56 = vld [vmem:[#allocation8 + $0x38] sm:$0xf0]  ;;  %349 = vmatpush.bf16.msrb.mxu1 %v451_v48 }
  0xc3   :  { %v205_v62 = vsub.f32 1.0, %v204_v58  ;;  %v231_v31 = vmul.f32 32.0, %v501_v30  ;;  %vm235_vm9 = vweird.f32 %v501_v30 }
  0xc4   :  { %v166_v63 = vmul.f32 %v497_v53, %v165_v59  ;;  %v470_v59 = vld [vmem:[#allocation8 + $0xc] sm:$0xf0] }
  0xc5   :  { %v206_v3 = vmul.f32 %v499_v55, %v205_v62  ;;  %v232_v32 = vsub.f32 1.0, %v231_v31 }
  0xc6   :  { %v167_v5 = vadd.f32 %v497_v53, %v166_v63  ;;  %v435_v63 = vor.u32 %v470_v59, %v434_v57 }
  0xc7   :  { %v207_v7 = vadd.f32 %v499_v55, %v206_v3  ;;  %v233_v33 = vmul.f32 %v501_v30, %v232_v32  ;;  %v443_v3 = vor.u32 %v471_v2, %v442_v1 }
  0xc8   :  { %v171_v13 = vsel %vm170_vm4, %v497_v53, %v167_v5  ;;  %v455_v53 = vor.u32 %v472_v46, %v452_v49  ;;  %v444_v5 = vld [vmem:[#allocation8 + $0x18] sm:$0xf0]  ;;  %350 = vmatpush.bf16.msrb.mxu1 %v435_v63 }
  0xc9   :  { %v176_v16 = vsel %vm173_vm6, %v175_v6, %v171_v13  ;;  %v211_v17 = vsel %vm210_vm7, %v499_v55, %v207_v7  ;;  %v234_v9 = vadd.f32 %v501_v30, %v233_v33  ;;  %v473_v55 = vld [vmem:[#allocation8 + $0x2c] sm:$0xf]  ;;  %v447_v6 = vor.u32 %v469_v4, %v444_v5  ;;  %378 = vmatpush.bf16.msra.mxu3 %v443_v3 }
  0xca   :  { %v177_v18 = vmul.f32 %v176_v16, %v152_v8  ;;  %v216_v19 = vsel %vm213_vm8, %v215_v14, %v211_v17  ;;  %v463_v58 = vor.u32 %v473_v55, %v460_v56  ;;  %363 = vmatpush.bf16.msra.mxu2 %v455_v53 }
  0xcb   :  { %v217_v20 = vmul.f32 %v216_v19, %v192_v15  ;;  %v236_v34 = vsel %vm235_vm9, %v501_v30, %v234_v9  ;;  %v495_v30 = vld [vmem:[#allocation7 + $0x2] ss:$0 sm:$0xff] }
  0xcc   :  { %v430_v21 = vclamps-f32 %v177_v18, 1.0  ;;  %391 = vmatpush.bf16.msrb.mxu0 %v463_v58 }
  0xcd   :  { %v431_v24 = vclamps-f32 %v217_v20, 1.0 }
  0xce   :  { %v220_v23 = vadd.f32 1.0, %v430_v21  ;;  %364 = vmatpush.bf16.msra.mxu2 %v439_v0 }
  0xcf   :  { %v221_v26 = vadd.f32 1.0, %v431_v24 }
  0xd0   :  { %v222_v25 = vmul.f32 %v220_v23, %v136_v22  ;;  %392 = vmatpush.bf16.msrb.mxu0 %v447_v6 }
  0xd1   :  { %v223_v28 = vmul.f32 %v221_v26, %v137_v27  ;;  %v494_v26 = vld [vmem:[#allocation7 + $0x1] ss:$0 sm:$0xff] }
  0xd2   :  { %v224_v11 = vsel %vm106_vm0, %v222_v25, 0.0 }
  0xd3   :  { %225 = vadd.xlane.f32.xlu0 %v224_v11  ;;  %v227_v12 = vsel %vm106_vm0, %v223_v28, 0.0 }
  0xdb   :  { %228 = vadd.xlane.f32.xlu0 %v227_v12 }
 0x146   :  { %v226_v35 = vpop.xlane.xlu0 %225 }
 0x147   :  { %v237_v36 = vmul.f32 %v236_v34, %v226_v35 }
 0x149   :  { %v738_v37 = vsub.f32 %v222_v25, %v237_v36 }
 0x14b   :  { %v241_v10 = vmul.f32 %v738_v37, %v738_v37 }
 0x14d   :  { %v243_v38 = vsel %vm106_vm0, %v241_v10, 0.0 }
 0x14e   :  { %244 = vadd.xlane.f32.xlu1 %v243_v38  ;;  %v229_v39 = vpop.xlane.xlu0 %228 }
 0x14f   :  { %v238_v40 = vmul.f32 %v236_v34, %v229_v39 }
 0x151   :  { %v743_v41 = vsub.f32 %v223_v28, %v238_v40 }
 0x153   :  { %v242_v42 = vmul.f32 %v743_v41, %v743_v41 }
 0x155   :  { %v246_v43 = vsel %vm106_vm0, %v242_v42, 0.0 }
 0x156   :  { %247 = vadd.xlane.f32.xlu1 %v246_v43 }
 0x1c1   :  { %v245_v47 = vpop.xlane.xlu1 %244 }
 0x1c2   :  { %v249_v52 = vmul.f32 %v245_v47, %v236_v34 }
 0x1c4   :  { %v251_v62 = vadd.f32 1e-12, %v249_v52 }
 0x1c6   :  { %502 = vrsqrt.f32 %v251_v62  ;;  %vm259_vm11 = vweird.f32 %v251_v62 }
 0x1c9   :  { %v248_v7 = vpop.xlane.xlu1 %247 }
 0x1ca   :  { %v250_v8 = vmul.f32 %v248_v7, %v236_v34  ;;  %v290_v34 = vld [vmem:[#allocation10] sm:$0xf] }
 0x1cb   :  { %v292_v35 = vperm.slane %v290_v34, 0  ;;  %v295_v36 = vperm.slane %v290_v34, 3  ;;  %v293_v40 = vperm.slane %v290_v34, 1 }
 0x1cc   :  { %v503_v13 = vpop.eup %502  ;;  %v252_v14 = vadd.f32 1e-12, %v250_v8 }
 0x1cd   :  { %v254_v15 = vmul.f32 %v503_v13, %v251_v62  ;;  %vm260_vm10 = vweird.f32 %v503_v13 }
 0x1ce   :  { %504 = vrsqrt.f32 %v252_v14  ;;  %vm261_vm12 = vmor %vm259_vm11, %vm260_vm10  ;;  %vm269_vm14 = vweird.f32 %v252_v14 }
 0x1cf   :  { %v255_v16 = vmul.f32 %v503_v13, %v254_v15 }
 0x1d1   :  { %v256_v17 = vmul.f32 0.5, %v255_v16 }
 0x1d3   :  { %v257_v18 = vsub.f32 1.5, %v256_v17 }
 0x1d4   :  { %v505_v19 = vpop.eup %504 }
 0x1d5   :  { %v258_v20 = vmul.f32 %v503_v13, %v257_v18  ;;  %v264_v21 = vmul.f32 %v505_v19, %v252_v14  ;;  %vm270_vm13 = vweird.f32 %v505_v19 }
 0x1d6   :  { %vm271_vm15 = vmor %vm269_vm14, %vm270_vm13 }
 0x1d7   :  { %v265_v22 = vmul.f32 %v505_v19, %v264_v21  ;;  %v262_v23 = vsel %vm261_vm12, %v503_v13, %v258_v20 }
 0x1d8   :  { %v273_v11 = vmul.f32 %v262_v23, %v738_v37 }
 0x1d9   :  { %v266_v24 = vmul.f32 0.5, %v265_v22 }
 0x1da   :  { %v276_v29 = vmul.f32 %v494_v26, %v273_v11 }
 0x1db   :  { %v267_v25 = vsub.f32 1.5, %v266_v24 }
 0x1dc   :  { %v279_v32 = vadd.f32 %v495_v30, %v276_v29 }
 0x1dd   :  { %v268_v27 = vmul.f32 %v505_v19, %v267_v25 }
 0x1df   :  { %v272_v28 = vsel %vm271_vm15, %v505_v19, %v268_v27 }
 0x1e0   :  { %v274_v12 = vmul.f32 %v272_v28, %v743_v41  ;;  %v294_v41 = vperm.slane %v290_v34, 2 }
 0x1e2   :  { %v277_v31 = vmul.f32 %v494_v26, %v274_v12 }
 0x1e4   :  { %v280_v33 = vadd.f32 %v495_v30, %v277_v31 }
 0x1e6   :  { %v281_v9 = vpack.c.bf16 %v280_v33, %v279_v32 }
 0x1e8   :  { %464 = vmatmul.msk.bf16.vlgmr.msrb.gmra.mxu1 %vm106_vm0, %v281_v9  ;;  %465 = vmatmul.msk.bf16.vlgmr.msra.gmra.mxu2 %vm106_vm0, %v281_v9 }
 0x1e9   :  { %466 = vmatmul.msk.bf16.vlgmr.msra.gmra.mxu3 %vm106_vm0, %v281_v9  ;;  %467 = vmatmul.msk.bf16.vlgmr.msrb.gmra.mxu0 %vm106_vm0, %v281_v9 }
 0x265   :  { %v352_v37 = vpop.f32.mrf.mxu1 }
 0x266   :  { %v353_v10 = vadd.f32 %v352_v37, %v292_v35  ;;  %v394_v38 = vpop.f32.mrf.mxu0 }
 0x267   :  { %v395_v39 = vadd.f32 %v394_v38, %v295_v36 }
 0x268   :  { %399 = vst [vmem:[#allocation11] sm:$0xff] %v353_v10 }
 0x269   :  { %402 = vst [vmem:[#allocation11 + $0x18] sm:$0xff] %v395_v39 }
 0x26b   :  { %v366_v42 = vpop.f32.mrf.mxu2 }
 0x26c   :  { %v367_v43 = vadd.f32 %v366_v42, %v293_v40  ;;  %v380_v44 = vpop.f32.mrf.mxu3 }
 0x26d   :  { %v381_v45 = vadd.f32 %v380_v44, %v294_v41  ;;  %v354_v46 = vpop.f32.mrf.mxu1 }
 0x26e   :  { %400 = vst [vmem:[#allocation11 + $0x8] sm:$0xff] %v367_v43  ;;  %v355_v47 = vadd.f32 %v354_v46, %v292_v35  ;;  %v396_v48 = vpop.f32.mrf.mxu0 }
 0x26f   :  { %401 = vst [vmem:[#allocation11 + $0x10] sm:$0xff] %v381_v45  ;;  %v397_v49 = vadd.f32 %v396_v48, %v295_v36 }
 0x270   :  { %403 = vst [vmem:[#allocation11 + $0x20] sm:$0xff] %v355_v47 }
 0x271   :  { %406 = vst [vmem:[#allocation11 + $0x38] sm:$0xff] %v397_v49 }
 0x273   :  { %v368_v50 = vpop.f32.mrf.mxu2 }
 0x274   :  { %v369_v51 = vadd.f32 %v368_v50, %v293_v40  ;;  %v382_v52 = vpop.f32.mrf.mxu3 }
 0x275   :  { %v383_v53 = vadd.f32 %v382_v52, %v294_v41 }
 0x276   :  { %404 = vst [vmem:[#allocation11 + $0x28] sm:$0xff] %v369_v51 }
 0x277   :  { %405 = vst [vmem:[#allocation11 + $0x30] sm:$0xff] %v383_v53 }
 0x278   :  { %419 = dma.vmem_to_hbm [thread:$0]  %s412_s4, 1024, %s414_s21, [#allocation4], %s669_s22, %s669_s22, %s670_s23  }
 0x279   :  { %656 = dma.done.wait [#allocation4], 1024  }
 0x27a   :  { %657 = vsyncadd [#allocation4], 4294966272 }
 0x27b   :  { %424 = vsyncpa [#allocation3], 1 }
 0x27c   :  { %425 = vsyncpa [#allocation6], 1 }
 0x27d   :  { %426 = vsyncpa [#allocation9], 1 }
 0x27e   :  { %427 = vsyncpa [#allocation4], 1 }

</bundles_post_ra>
